<compile_context>
chip_gen: v6e
topology: v6e:2x2x1
jax: 0.10.0
libtpu: 0.0.40
codegen_flags: <defaults>
</compile_context>

<pallas_src>
import jax
import jax.numpy as jnp
from jax.experimental import pallas as pl
from jax.experimental.pallas import tpu as pltpu

NOUT = 7       # logical number of output classes
NOUT_PAD = 8   # padded output width (full-array last dim, so (tm, 8) blocks are legal)


def mlp_kernel(x_ref,
               w1_ref, b1_ref,
               w2_ref, b2_ref,
               w3_ref, b3_ref,
               w4_ref, b4_ref,
               out_ref):
    # Layer 1: Linear(5 -> 128) (+ folded BN) + ReLU   (x already bf16)
    h = jnp.dot(x_ref[...], w1_ref[...], preferred_element_type=jnp.float32) + b1_ref[...]
    h = jnp.maximum(h, 0.0)

    # Layer 2: Linear(128 -> 64) (+ folded BN) + ReLU
    h = jnp.dot(h.astype(jnp.bfloat16), w2_ref[...],
                preferred_element_type=jnp.float32) + b2_ref[...]
    h = jnp.maximum(h, 0.0)

    # Layer 3: Linear(64 -> 32) (+ folded BN) + ReLU
    h = jnp.dot(h.astype(jnp.bfloat16), w3_ref[...],
                preferred_element_type=jnp.float32) + b3_ref[...]
    h = jnp.maximum(h, 0.0)

    # Layer 4: Linear(32 -> 7), columns padded to 8 (pad col: W=0, bias=-1e30 in f32)
    logits = jnp.dot(h.astype(jnp.bfloat16), w4_ref[...],
                     preferred_element_type=jnp.float32) + b4_ref[...]

    # Softmax along the feature axis; the padded column gives exp(-huge) = 0 exactly.
    m = jnp.max(logits, axis=1, keepdims=True)
    e = jnp.exp(logits - m)
    denom = jnp.sum(e, axis=1, keepdims=True)
    out_ref[...] = e / denom


def make_params(key):
    """Synthetic parameters mirroring the PyTorch module, with eval-mode BN folded in."""
    dims = [5, 128, 64, 32, NOUT]
    eps = 1e-5
    ks = jax.random.split(key, 8)

    raw = {}
    for li, (din, dout) in enumerate(zip(dims[:-1], dims[1:]), start=1):
        bound = 1.0 / float(jnp.sqrt(jnp.float32(din)))
        # PyTorch stores W as [out, in]; we use [in, out] so the kernel does x @ W.
        raw[f"w{li}"] = jax.random.uniform(ks[2 * (li - 1)], (din, dout),
                                           minval=-bound, maxval=bound,
                                           dtype=jnp.float32)
        raw[f"b{li}"] = jax.random.uniform(ks[2 * (li - 1) + 1], (1, dout),
                                           minval=-bound, maxval=bound,
                                           dtype=jnp.float32)

    params = {}
    # Fold eval-mode BatchNorm1d (PyTorch defaults: gamma=1, beta=0, mean=0, var=1).
    # TODO(synk): fold the real running stats when loading a trained checkpoint.
    for li, f in zip((1, 2, 3), (128, 64, 32)):
        gamma = jnp.ones((1, f), jnp.float32)
        beta = jnp.zeros((1, f), jnp.float32)
        rmean = jnp.zeros((1, f), jnp.float32)
        rvar = jnp.ones((1, f), jnp.float32)
        scale = gamma / jnp.sqrt(rvar + eps)
        shift = beta - rmean * scale
        params[f"w{li}"] = (raw[f"w{li}"] * scale).astype(jnp.bfloat16)
        params[f"b{li}"] = raw[f"b{li}"] * scale + shift  # f32

    # Layer 4: pad [32, 7] -> [32, 8]; pad column W=0, bias=-1e30 (f32 only).
    w4 = jnp.zeros((32, NOUT_PAD), jnp.float32).at[:, :NOUT].set(raw["w4"])
    b4 = jnp.full((1, NOUT_PAD), -1e30, jnp.float32).at[:, :NOUT].set(raw["b4"])
    params["w4"] = w4.astype(jnp.bfloat16)
    params["b4"] = b4  # f32 (pad-bias trick requires f32)
    return params


def _round_up(n, m):
    return ((n + m - 1) // m) * m


def _cdiv(a, b):
    return -(-a // b)


def mlp_forward(x, params, *, block_m=2048):
    B, F = x.shape
    assert F == 5

    # Tile selection: bound wasted padded rows to <8 per tile and, when B > 8, force
    # at least 2 grid steps so v7x's two TensorCores both get work (harmless on 1-TC chips).
    n_tiles = max(_cdiv(B, block_m), 1)
    if B > 8:
        n_tiles = max(n_tiles, 2)
    tm = _round_up(_cdiv(B, n_tiles), 8)
    b_pad = n_tiles * tm

    # Halve the input HBM read; MXU inputs are bf16 anyway.
    x = x.astype(jnp.bfloat16)
    if b_pad != B:
        x = jnp.pad(x, ((0, b_pad - B), (0, 0)))  # zero padding only (never NaN)

    args = (x,
            params["w1"], params["b1"],
            params["w2"], params["b2"],
            params["w3"], params["b3"],
            params["w4"], params["b4"])

    def _resident(i):          # weights/biases: same block every grid step
        return (0, 0)

    in_specs = [pl.BlockSpec((tm, 5), lambda i: (i, 0))]
    in_specs += [pl.BlockSpec(a.shape, _resident) for a in args[1:]]

    flops = 2 * b_pad * (5 * 128 + 128 * 64 + 64 * 32 + 32 * NOUT_PAD)
    bytes_accessed = (b_pad * (5 * 2 + NOUT_PAD * 4)
                      + sum(int(a.size) * a.dtype.itemsize for a in args[1:]))
    cost = pl.CostEstimate(flops=flops,
                           transcendentals=b_pad * NOUT_PAD,
                           bytes_accessed=bytes_accessed)

    out_pad = pl.pallas_call(
        mlp_kernel,
        out_shape=jax.ShapeDtypeStruct((b_pad, NOUT_PAD), jnp.float32),
        grid=(b_pad // tm,),
        in_specs=in_specs,
        out_specs=pl.BlockSpec((tm, NOUT_PAD), lambda i: (i, 0)),
        compiler_params=pltpu.CompilerParams(
            dimension_semantics=("parallel",)),
        cost_estimate=cost,
    )(*args)

    return out_pad[:B, :NOUT]


def mlp_reference(x, params):
    """Pure-JAX f32 reference using the same (folded) parameters."""
    h = x
    for li in (1, 2, 3):
        w = params[f"w{li}"].astype(jnp.float32)
        h = jnp.maximum(h @ w + params[f"b{li}"], 0.0)
    w4 = params["w4"].astype(jnp.float32)[:, :NOUT]
    b4 = params["b4"][:, :NOUT]
    return jax.nn.softmax(h @ w4 + b4, axis=1)


if __name__ == "__main__":
    key = jax.random.PRNGKey(0)
    kx, kp = jax.random.split(key)

    B = 8
    x = jax.random.normal(kx, (B, 5), dtype=jnp.float32)
    params = make_params(kp)

    out = jax.jit(mlp_forward)(x, params)
    jax.block_until_ready(out)

    assert out.shape == (B, NOUT)
    # Rows sum to 1 (exact divide in the softmax epilogue).
    assert jnp.allclose(jnp.sum(out, axis=1), 1.0, atol=1e-5)
    # Matches f32 reference within bf16-matmul tolerance.
    ref = mlp_reference(x, params)
    assert jnp.allclose(out, ref, atol=2e-2)

    print("KERNEL_OK")
</pallas_src>

<mosaic_0001>
module attributes {stable_mosaic.version = 11 : i64} {
  func.func @mlp_kernel(%arg0: i32, %arg1: memref<8x5xbf16, #tpu.memory_space<vmem>>, %arg2: memref<5x128xbf16, #tpu.memory_space<vmem>>, %arg3: memref<1x128xf32, #tpu.memory_space<vmem>>, %arg4: memref<128x64xbf16, #tpu.memory_space<vmem>>, %arg5: memref<1x64xf32, #tpu.memory_space<vmem>>, %arg6: memref<64x32xbf16, #tpu.memory_space<vmem>>, %arg7: memref<1x32xf32, #tpu.memory_space<vmem>>, %arg8: memref<32x8xbf16, #tpu.memory_space<vmem>>, %arg9: memref<1x8xf32, #tpu.memory_space<vmem>>, %arg10: memref<8x8xf32, #tpu.memory_space<vmem>>) attributes {dimension_semantics = [#tpu.dimension_semantics<parallel>], iteration_bounds = array<i64: 1>, scalar_prefetch = 0 : i64, scratch_operands = 0 : i64, tpu.core_type = #tpu.core_type<tc>, window_params = [{transform_indices = @transform_0, window_bounds = array<i64: 8, 5>}, {pipeline_mode = #tpu.pipeline_mode<synchronous>, transform_indices = @transform_1, window_bounds = array<i64: 5, 128>}, {pipeline_mode = #tpu.pipeline_mode<synchronous>, transform_indices = @transform_2, window_bounds = array<i64: 1, 128>}, {pipeline_mode = #tpu.pipeline_mode<synchronous>, transform_indices = @transform_3, window_bounds = array<i64: 128, 64>}, {pipeline_mode = #tpu.pipeline_mode<synchronous>, transform_indices = @transform_4, window_bounds = array<i64: 1, 64>}, {pipeline_mode = #tpu.pipeline_mode<synchronous>, transform_indices = @transform_5, window_bounds = array<i64: 64, 32>}, {pipeline_mode = #tpu.pipeline_mode<synchronous>, transform_indices = @transform_6, window_bounds = array<i64: 1, 32>}, {pipeline_mode = #tpu.pipeline_mode<synchronous>, transform_indices = @transform_7, window_bounds = array<i64: 32, 8>}, {pipeline_mode = #tpu.pipeline_mode<synchronous>, transform_indices = @transform_8, window_bounds = array<i64: 1, 8>}, {transform_indices = @transform_9, window_bounds = array<i64: 8, 8>}]} {
    %c0 = arith.constant 0 : index
    %c0_0 = arith.constant 0 : index
    %0 = vector.load %arg1[%c0, %c0_0] : memref<8x5xbf16, #tpu.memory_space<vmem>>, vector<8x5xbf16>
    %c0_1 = arith.constant 0 : index
    %c0_2 = arith.constant 0 : index
    %1 = vector.load %arg2[%c0_1, %c0_2] : memref<5x128xbf16, #tpu.memory_space<vmem>>, vector<5x128xbf16>
    %cst = arith.constant dense<0.000000e+00> : vector<8x128xf32>
    %2 = tpu.matmul %0, %1, %cst {dimension_numbers = #tpu.dot_dimension_numbers<[1], [0], [0], [1], [0, 0, 1, 1], [], []>} : vector<8x5xbf16>, vector<5x128xbf16>, vector<8x128xf32> -> vector<8x128xf32>
    %c0_3 = arith.constant 0 : index
    %c0_4 = arith.constant 0 : index
    %3 = vector.load %arg3[%c0_3, %c0_4] : memref<1x128xf32, #tpu.memory_space<vmem>>, vector<1x128xf32>
    %4 = vector.broadcast %3 : vector<1x128xf32> to vector<8x128xf32>
    %5 = arith.addf %2, %4 : vector<8x128xf32>
    %cst_5 = arith.constant 0.000000e+00 : f32
    %6 = vector.broadcast %cst_5 : f32 to vector<8x128xf32>
    %7 = arith.maximumf %5, %6 : vector<8x128xf32>
    %8 = arith.truncf %7 : vector<8x128xf32> to vector<8x128xbf16>
    %c0_6 = arith.constant 0 : index
    %c0_7 = arith.constant 0 : index
    %9 = vector.load %arg4[%c0_6, %c0_7] : memref<128x64xbf16, #tpu.memory_space<vmem>>, vector<128x64xbf16>
    %cst_8 = arith.constant dense<0.000000e+00> : vector<8x64xf32>
    %10 = tpu.matmul %8, %9, %cst_8 {dimension_numbers = #tpu.dot_dimension_numbers<[1], [0], [0], [1], [0, 0, 1, 1], [], []>} : vector<8x128xbf16>, vector<128x64xbf16>, vector<8x64xf32> -> vector<8x64xf32>
    %c0_9 = arith.constant 0 : index
    %c0_10 = arith.constant 0 : index
    %11 = vector.load %arg5[%c0_9, %c0_10] : memref<1x64xf32, #tpu.memory_space<vmem>>, vector<1x64xf32>
    %12 = vector.broadcast %11 : vector<1x64xf32> to vector<8x64xf32>
    %13 = arith.addf %10, %12 : vector<8x64xf32>
    %cst_11 = arith.constant 0.000000e+00 : f32
    %14 = vector.broadcast %cst_11 : f32 to vector<8x64xf32>
    %15 = arith.maximumf %13, %14 : vector<8x64xf32>
    %16 = arith.truncf %15 : vector<8x64xf32> to vector<8x64xbf16>
    %c0_12 = arith.constant 0 : index
    %c0_13 = arith.constant 0 : index
    %17 = vector.load %arg6[%c0_12, %c0_13] : memref<64x32xbf16, #tpu.memory_space<vmem>>, vector<64x32xbf16>
    %cst_14 = arith.constant dense<0.000000e+00> : vector<8x32xf32>
    %18 = tpu.matmul %16, %17, %cst_14 {dimension_numbers = #tpu.dot_dimension_numbers<[1], [0], [0], [1], [0, 0, 1, 1], [], []>} : vector<8x64xbf16>, vector<64x32xbf16>, vector<8x32xf32> -> vector<8x32xf32>
    %c0_15 = arith.constant 0 : index
    %c0_16 = arith.constant 0 : index
    %19 = vector.load %arg7[%c0_15, %c0_16] : memref<1x32xf32, #tpu.memory_space<vmem>>, vector<1x32xf32>
    %20 = vector.broadcast %19 : vector<1x32xf32> to vector<8x32xf32>
    %21 = arith.addf %18, %20 : vector<8x32xf32>
    %cst_17 = arith.constant 0.000000e+00 : f32
    %22 = vector.broadcast %cst_17 : f32 to vector<8x32xf32>
    %23 = arith.maximumf %21, %22 : vector<8x32xf32>
    %24 = arith.truncf %23 : vector<8x32xf32> to vector<8x32xbf16>
    %c0_18 = arith.constant 0 : index
    %c0_19 = arith.constant 0 : index
    %25 = vector.load %arg8[%c0_18, %c0_19] : memref<32x8xbf16, #tpu.memory_space<vmem>>, vector<32x8xbf16>
    %cst_20 = arith.constant dense<0.000000e+00> : vector<8x8xf32>
    %26 = tpu.matmul %24, %25, %cst_20 {dimension_numbers = #tpu.dot_dimension_numbers<[1], [0], [0], [1], [0, 0, 1, 1], [], []>} : vector<8x32xbf16>, vector<32x8xbf16>, vector<8x8xf32> -> vector<8x8xf32>
    %c0_21 = arith.constant 0 : index
    %c0_22 = arith.constant 0 : index
    %27 = vector.load %arg9[%c0_21, %c0_22] : memref<1x8xf32, #tpu.memory_space<vmem>>, vector<1x8xf32>
    %28 = vector.broadcast %27 : vector<1x8xf32> to vector<8x8xf32>
    %29 = arith.addf %26, %28 : vector<8x8xf32>
    %cst_23 = arith.constant dense<0xFF800000> : vector<8xf32>
    %30 = vector.multi_reduction <maximumf>, %29, %cst_23 [1] : vector<8x8xf32> to vector<8xf32>
    %31 = vector.shape_cast %30 : vector<8xf32> to vector<8x1xf32>
    %32 = vector.broadcast %31 : vector<8x1xf32> to vector<8x8xf32>
    %33 = arith.subf %29, %32 : vector<8x8xf32>
    %34 = math.exp %33 : vector<8x8xf32>
    %cst_24 = arith.constant dense<0.000000e+00> : vector<8xf32>
    %35 = vector.multi_reduction <add>, %34, %cst_24 [1] : vector<8x8xf32> to vector<8xf32>
    %36 = vector.shape_cast %35 : vector<8xf32> to vector<8x1xf32>
    %37 = vector.broadcast %36 : vector<8x1xf32> to vector<8x8xf32>
    %38 = arith.divf %34, %37 : vector<8x8xf32>
    %c0_25 = arith.constant 0 : index
    %c0_26 = arith.constant 0 : index
    %39 = vector.load %arg10[%c0_25, %c0_26] : memref<8x8xf32, #tpu.memory_space<vmem>>, vector<8x8xf32>
    tpu.vector_store %arg10[%c0_25, %c0_26], %38 {strides = array<i32>} : memref<8x8xf32, #tpu.memory_space<vmem>>, vector<8x8xf32>,
    return
  }
  func.func @transform_0(%arg0: i32) -> (i32, i32) {
    %c0_i32 = arith.constant 0 : i32
    %c0_i32_0 = arith.constant 0 : i32
    return %arg0, %c0_i32 : i32, i32
  }
  func.func @transform_1(%arg0: i32) -> (i32, i32) {
    %c0_i32 = arith.constant 0 : i32
    %c0_i32_0 = arith.constant 0 : i32
    %c0_i32_1 = arith.constant 0 : i32
    return %c0_i32, %c0_i32_0 : i32, i32
  }
  func.func @transform_2(%arg0: i32) -> (i32, i32) {
    %c0_i32 = arith.constant 0 : i32
    %c0_i32_0 = arith.constant 0 : i32
    %c0_i32_1 = arith.constant 0 : i32
    return %c0_i32, %c0_i32_0 : i32, i32
  }
  func.func @transform_3(%arg0: i32) -> (i32, i32) {
    %c0_i32 = arith.constant 0 : i32
    %c0_i32_0 = arith.constant 0 : i32
    %c0_i32_1 = arith.constant 0 : i32
    return %c0_i32, %c0_i32_0 : i32, i32
  }
  func.func @transform_4(%arg0: i32) -> (i32, i32) {
    %c0_i32 = arith.constant 0 : i32
    %c0_i32_0 = arith.constant 0 : i32
    %c0_i32_1 = arith.constant 0 : i32
    return %c0_i32, %c0_i32_0 : i32, i32
  }
  func.func @transform_5(%arg0: i32) -> (i32, i32) {
    %c0_i32 = arith.constant 0 : i32
    %c0_i32_0 = arith.constant 0 : i32
    %c0_i32_1 = arith.constant 0 : i32
    return %c0_i32, %c0_i32_0 : i32, i32
  }
  func.func @transform_6(%arg0: i32) -> (i32, i32) {
    %c0_i32 = arith.constant 0 : i32
    %c0_i32_0 = arith.constant 0 : i32
    %c0_i32_1 = arith.constant 0 : i32
    return %c0_i32, %c0_i32_0 : i32, i32
  }
  func.func @transform_7(%arg0: i32) -> (i32, i32) {
    %c0_i32 = arith.constant 0 : i32
    %c0_i32_0 = arith.constant 0 : i32
    %c0_i32_1 = arith.constant 0 : i32
    return %c0_i32, %c0_i32_0 : i32, i32
  }
  func.func @transform_8(%arg0: i32) -> (i32, i32) {
    %c0_i32 = arith.constant 0 : i32
    %c0_i32_0 = arith.constant 0 : i32
    %c0_i32_1 = arith.constant 0 : i32
    return %c0_i32, %c0_i32_0 : i32, i32
  }
  func.func @transform_9(%arg0: i32) -> (i32, i32) {
    %c0_i32 = arith.constant 0 : i32
    %c0_i32_0 = arith.constant 0 : i32
    return %arg0, %c0_i32 : i32, i32
  }
}

</mosaic_0001>

<bundles_post_ra>
// kernel: mlp_forward.1
= control target key start
LH: loop header
LB: loop body
LE: loop exit
PB: predicated region body
PF: predicated region fallthrough
CT: control target
= control target key end

     0   :  { %vm47_vm0 = vcmask 1041408   ;;  %vm48_vm1 = vcmask 1042432   ;;  %v518_v1 = vmov 0.0   ;;  %v519_v2 = vmov 65535   ;;  %s661_s0 = inlined_call_operand.vmem [shape: bf16[8,5], index: 0, kind: input, shape index: {}]   ;;  %s662_s1 = inlined_call_operand.vmem [shape: bf16[5,128], index: 1, kind: input, shape index: {}]   ;;  %s663_s2 = inlined_call_operand.vmem [shape: f32[1,128], index: 2, kind: input, shape index: {}]   ;;  %s664_s3 = inlined_call_operand.vmem [shape: bf16[128,64], index: 3, kind: input, shape index: {}]   ;;  %s665_s4 = inlined_call_operand.vmem [shape: f32[1,64], index: 4, kind: input, shape index: {}]   ;;  %s666_s5 = inlined_call_operand.vmem [shape: bf16[64,32], index: 5, kind: input, shape index: {}]   ;;  %s667_s6 = inlined_call_operand.vmem [shape: f32[1,32], index: 6, kind: input, shape index: {}]   ;;  %s668_s7 = inlined_call_operand.vmem [shape: bf16[32,8], index: 7, kind: input, shape index: {}]   ;;  %s669_s8 = inlined_call_operand.vmem [shape: f32[1,8], index: 8, kind: input, shape index: {}]   ;;  %s670_s9 = inlined_call_operand.hbm [shape: f32[8,8], index: 9, kind: output, shape index: {}]  }
   0x1   :  { %v35_v0 = vld [vmem:[%s662_s1] sm:$0x7]  ;;  %428 = vmatprep.subr.bf16.mxu0 %v518_v1  ;;  %v49_v3 = vsel %vm47_vm0, 4294967295, %v519_v2  ;;  %434 = vmatprep.subr.bf16.mxu1 %v518_v1  ;;  %v478_v4 = vld [vmem:[%s664_s3 + $0x38] sm:$0xff]   ;;  %vm520_vm2 = vmmov 0   ;;  %v479_v6 = vld [vmem:[%s664_s3 + $0x30] sm:$0xff]  }
   0x2   :  { %v50_v5 = vsel %vm48_vm1, %v49_v3, 0  ;;  %430 = vmatprep.mubr.msk.bf16.mxu0 %vm520_vm2, %v518_v1  ;;  %450 = vmatprep.mubr.msk.bf16.mxu1 %vm520_vm2, %v518_v1  ;;  %v34_v8 = vld [vmem:[%s661_s0] sm:$0xf]  ;;  %vm43_vm3 = vcmask 39936   ;;  %v480_v9 = vld [vmem:[%s664_s3 + $0x28] sm:$0xff]  }
   0x3   :  { %v52_v7 = vand.u32 %v50_v5, %v35_v0  ;;  %435 = vmatpush3.bf16.msra.mxu1 %v478_v4  ;;  %v481_v10 = vld [vmem:[%s664_s3 + $0x20] sm:$0xff]  }
   0x4   :  { %436 = vmatprep.subr.bf16.mxu1 %v518_v1 }
   0x5   :  { %429 = vmatpush3.bf16.msra.mxu0 %v52_v7 }
   0x6   :  { %454 = vmatprep.subr.bf16.mxu0 %v518_v1 }
   0x7   :  { %437 = vmatpush3.bf16.msra.mxu1 %v479_v6 }
   0x8   :  { %431 = vmatmul.mubr.msk.bf16.vlgmr.msra.gmra.mxu0 %vm43_vm3, %v34_v8  ;;  %438 = vmatprep.subr.bf16.mxu1 %v518_v1 }
   0x9   :  { %462 = vmatprep.mubr.msk.bf16.mxu0 %vm520_vm2, %v518_v1 }
   0xb   :  { %439 = vmatpush3.bf16.msra.mxu1 %v480_v9 }
   0xc   :  { %440 = vmatprep.subr.bf16.mxu1 %v518_v1 }
   0xd   :  { %14 = vsyncpa [#allocation3], 0  ;;  %v482_v11 = vld [vmem:[%s664_s3 + $0x18] sm:$0xff]   ;;  %v483_v12 = vld [vmem:[%s664_s3 + $0x10] sm:$0xff]   ;;  %vm248_vm4 = vcmask 523264   ;;  %vm317_vm5 = vcmask 261120  }
   0xe   :  { %v484_v13 = vld [vmem:[%s664_s3 + $0x8] sm:$0xff]   ;;  %v485_v14 = vld [vmem:[%s664_s3] sm:$0xff]   ;;  %v486_v15 = vld [vmem:[%s666_s5 + $0x18] sm:$0xff]   ;;  %vm361_vm6 = vcmask 64512  }
   0xf   :  { %441 = vmatpush3.bf16.msra.mxu1 %v481_v10  ;;  %455 = vmatpush3.bf16.msra.mxu0 %v486_v15  ;;  %v487_v16 = vld [vmem:[%s666_s5 + $0x10] sm:$0xff]   ;;  %v388_v17 = vld [vmem:[%s663_s2] ss:$0 sm:$0xff]  ;;  %v488_v25 = vld [vmem:[%s666_s5 + $0x8] sm:$0xff]  }
  0x10   :  { %442 = vmatprep.subr.bf16.mxu1 %v518_v1  ;;  %456 = vmatprep.subr.bf16.mxu0 %v518_v1  ;;  %v489_v26 = vld [vmem:[%s666_s5] sm:$0xff]   ;;  %v490_v33 = vld [vmem:[%s668_s7 + $0x8] sm:$0xff]  }
  0x11   :  { %v390_v27 = vld [vmem:[%s665_s4] ss:$0 sm:$0xff] }
  0x12   :  { %v491_v36 = vld [vmem:[%s668_s7] sm:$0xff]  }
  0x13   :  { %443 = vmatpush3.bf16.msra.mxu1 %v482_v11  ;;  %457 = vmatpush3.bf16.msra.mxu0 %v487_v16  ;;  %v399_v37 = vld [vmem:[%s667_s6] ss:$0 sm:$0xff]  ;;  %s521_s6 = smov [#allocation2]  }
  0x14   :  { %444 = vmatprep.subr.bf16.mxu1 %v518_v1  ;;  %458 = vmatprep.subr.bf16.mxu0 %v518_v1  ;;  %v405_v45 = vld [vmem:[%s669_s8] ss:$0 sm:$0xff]  ;;  %s380_s7 = sshll.u32 %s521_s6, 4  ;;  %s381_s7 = int_to_ptr.vmem [resolvable:$true] %s380_s7 }
  0x15   :  { %s496_s8 = scalar_lea.vmem %s381_s7, 128  ;;  %p501_p1 = scmp.lt.s32.totalorder %s381_s7, %s381_s7 }
  0x16   :  { %p497_p0 = scmp.ne.s32.totalorder %s381_s7, %s496_s8  ;;  %p502_p2 = scmp.lt.s32.totalorder %s496_s8, %s496_s8 }
  0x17   :  { %445 = vmatpush3.bf16.msra.mxu1 %v483_v12  ;;  %459 = vmatpush3.bf16.msra.mxu0 %v488_v25 }
  0x18   :  { %446 = vmatprep.subr.bf16.mxu1 %v518_v1  ;;  %460 = vmatprep.subr.bf16.mxu0 %v518_v1  ;;  %p503_p3 = por %p502_p2, %p501_p1 }
  0x1a   :  { %p504_p4 = pnand %p503_p3, %p497_p0 }
  0x1b   :  { %447 = vmatpush3.bf16.msra.mxu1 %v484_v13  ;;  %461 = vmatpush3.bf16.msra.mxu0 %v489_v26 }
  0x1c   :  { %448 = vmatprep.subr.bf16.mxu1 %v518_v1  ;;  %466 = vmatprep.subr.bf16.mxu0 %v518_v1 }
  0x1f   :  { %449 = vmatpush3.bf16.msra.mxu1 %v485_v14 }
  0xc8   :  { %v88_v18 = vpop.f32.mrf.mxu0 }
  0xc9   :  { %v89_v19 = vadd.f32 %v388_v17, %v88_v18 }
  0xca   :  { %v432_v20 = vpop.f32.mrf.mxu0 }
  0xcb   :  { %v94_v21 = vmax.f32 %v89_v19, 0.0 }
  0xcc   :  { %v91_v22 = vpop.f32.mrf.mxu0 }
  0xcd   :  { %v95_v23 = vpack.c.bf16 %v94_v21, %v94_v21 }
  0xce   :  { %v433_v24 = vpop.f32.mrf.mxu0 }
  0xcf   :  { %451 = vmatmul.mubr.bf16.vlgmr.msra.gmra.mxu1 %v95_v23 }
 0x18f   :  { %v201_v28 = vpop.f32.mrf.mxu1 }
 0x190   :  { %v202_v29 = vadd.f32 %v390_v27, %v201_v28 }
 0x191   :  { %v452_v30 = vpop.f32.mrf.mxu1 }
 0x192   :  { %v207_v31 = vmax.f32 %v202_v29, 0.0 }
 0x193   :  { %v204_v32 = vpop.f32.mrf.mxu1 }
 0x194   :  { %v208_v34 = vpack.c.bf16 %v207_v31, %v207_v31 }
 0x195   :  { %v453_v35 = vpop.f32.mrf.mxu1 }
 0x196   :  { %463 = vmatmul.mubr.msk.bf16.vlgmr.msra.gmra.mxu0 %vm248_vm4, %v208_v34 }
 0x197   :  { %467 = vmatpush3.bf16.msra.mxu0 %v490_v33  ;;  %470 = vmatprep.mubr.msk.bf16.mxu0 %vm520_vm2, %v518_v1 }
 0x198   :  { %468 = vmatprep.subr.bf16.mxu0 %v518_v1 }
 0x19b   :  { %469 = vmatpush3.bf16.msra.mxu0 %v491_v36 }
 0x256   :  { %v286_v38 = vpop.f32.mrf.mxu0 }
 0x257   :  { %v287_v39 = vadd.f32 %v399_v37, %v286_v38 }
 0x258   :  { %v464_v40 = vpop.f32.mrf.mxu0 }
 0x259   :  { %v292_v41 = vmax.f32 %v287_v39, 0.0 }
 0x25a   :  { %v289_v42 = vpop.f32.mrf.mxu0 }
 0x25b   :  { %v293_v43 = vpack.c.bf16 %v292_v41, %v292_v41 }
 0x25c   :  { %v465_v44 = vpop.f32.mrf.mxu0 }
 0x25d   :  { %471 = vmatmul.mubr.msk.bf16.vlgmr.msra.gmra.mxu0 %vm317_vm5, %v293_v43 }
 0x31d   :  { %v355_v46 = vpop.f32.mrf.mxu0 }
 0x31e   :  { %v356_v47 = vadd.f32 %v405_v45, %v355_v46 }
 0x31f   :  { %v472_v48 = vpop.f32.mrf.mxu0 }
 0x320   :  { %v362_v49 = vsel %vm361_vm6, %v356_v47, -inf }
 0x321   :  { %363 = vmax.xlane.f32.xlu0 %v362_v49  ;;  %v358_v50 = vpop.f32.mrf.mxu0 }
 0x323   :  { %v473_v51 = vpop.f32.mrf.mxu0 }
 0x3aa   :  { %v364_v52 = vpop.xlane.xlu0 %363 }
 0x3ab   :  { %v365_v53 = vsub.f32 %v356_v47, %v364_v52 }
 0x3ad   :  { %v366_v54 = vmul.f32 1.442695, %v365_v53 }
 0x3af   :  { %492 = vpow2.f32 %v366_v54 }
 0x3bc   :  { %v493_v55 = vpop.eup %492 }
 0x3bd   :  { %v368_v56 = vsel %vm361_vm6, %v493_v55, 0.0 }
 0x3be   :  { %369 = vadd.xlane.f32.xlu0 %v368_v56 }
 0x447   :  { %v370_v57 = vpop.xlane.xlu0 %369 }
 0x448   :  { %494 = vrcp.f32 %v370_v57 }
 0x455   :  { %v495_v58 = vpop.eup %494 }
 0x456   :  { %v372_v59 = vmul.f32 %v495_v58, %v493_v55 }
 0x458   :  { %373 = vst.msk [vmem:[#allocation2] sm:$0xff] %vm361_vm6, %v372_v59 }
 0x459   :  { %507 = shalt.err (!%p504_p4)
}
 0x45a   :  { %383 = dma.vmem_to_hbm [thread:$0]  %s381_s7, 128, %s670_s9, [#allocation3]  }
 0x45b   :  { %516 = dma.done.wait [#allocation3], 128  }
 0x45c   :  { %517 = vsyncadd [#allocation3], 4294967168 }
 0x45d   :  { %387 = vsyncpa [#allocation3], 1 }

</bundles_post_ra>
